<compile_context>
chip_gen: v7x
topology: tpu7x:2x2x1
jax: 0.10.0
libtpu: 0.0.40
codegen_flags: <defaults>
</compile_context>

<pallas_src>
import jax
import jax.numpy as jnp
from jax import lax
from jax.experimental import pallas as pl
from jax.experimental.pallas import tpu as pltpu


def _align8(n: int) -> int:
    return ((n + 7) // 8) * 8


def pack_params(params, dtype=jnp.float32):
    """Pack (W1,b1,W2,b2,W3,b3) into one 2-D buffer with 8-aligned row segments.

    Layout (rows):
      [0           : obs_dim      ]  W1   (obs_dim, H1)
      [r_w2        : r_w2 + H1    ]  W2   (H1, H2)
      [r_w3        : r_w3 + n_out ]  W3^T (n_out, H2)
      [r_b                        ]  b1   (1, H1)
      [r_b + 1                    ]  b2   (1, H2)
      [r_b + 2     : r_b+2+n_out  ]  b3   (n_out, 1)   (column, for lane broadcast)
    """
    w1, b1, w2, b2, w3, b3 = params
    obs_dim, H1 = w1.shape
    H2 = w2.shape[1]
    n_out = w3.shape[1]

    C = max(H1, H2, 1)
    r_w2 = _align8(obs_dim)
    r_w3 = _align8(r_w2 + H1)
    r_b = _align8(r_w3 + n_out)
    R = _align8(r_b + 2 + n_out)

    packed = jnp.zeros((R, C), dtype)
    packed = packed.at[0:obs_dim, 0:H1].set(w1.astype(dtype))
    packed = packed.at[r_w2:r_w2 + H1, 0:H2].set(w2.astype(dtype))
    packed = packed.at[r_w3:r_w3 + n_out, 0:H2].set(w3.T.astype(dtype))
    packed = packed.at[r_b:r_b + 1, 0:H1].set(b1.reshape(1, H1).astype(dtype))
    packed = packed.at[r_b + 1:r_b + 2, 0:H2].set(b2.reshape(1, H2).astype(dtype))
    packed = packed.at[r_b + 2:r_b + 2 + n_out, 0:1].set(b3.reshape(n_out, 1).astype(dtype))
    return packed, (r_w2, r_w3, r_b)


def _make_kernel(obs_dim, H1, H2, n_out, offs, compute_dtype):
    r_w2, r_w3, r_b = offs

    def kernel(x_ref, p_ref, out_ref):
        # Static ref-slices of the single packed parameter buffer (one DMA total).
        w1 = p_ref[0:obs_dim, 0:H1]                       # (obs_dim, H1)
        w2 = p_ref[r_w2:r_w2 + H1, 0:H2]                  # (H1, H2)
        w3t = p_ref[r_w3:r_w3 + n_out, 0:H2]              # (n_out, H2)  == W3^T
        b1 = p_ref[r_b:r_b + 1, 0:H1]                     # (1, H1)
        b2 = p_ref[r_b + 1:r_b + 2, 0:H2]                 # (1, H2)
        b3 = p_ref[r_b + 2:r_b + 2 + n_out, 0:1]          # (n_out, 1)

        x = x_ref[...]                                    # (TB, obs_dim), compute dtype

        # Hidden layer 1: Linear + ReLU  (f32 accumulation, f32 elementwise)
        h1 = jnp.dot(x, w1, preferred_element_type=jnp.float32) + b1
        h1 = jnp.maximum(h1, 0.0)

        # Hidden layer 2: Linear + ReLU
        h2 = jnp.dot(h1.astype(compute_dtype), w2,
                     preferred_element_type=jnp.float32) + b2
        h2 = jnp.maximum(h2, 0.0)

        # Output layer (identity activation), computed transposed:
        #   v^T = W3^T (n_out, H2) . h2^T  ->  (n_out, TB)
        # so the result (and its store) is lane-dense along the batch tile.
        vt = lax.dot_general(
            w3t, h2.astype(compute_dtype),
            dimension_numbers=(((1,), (1,)), ((), ())),
            preferred_element_type=jnp.float32)
        out_ref[...] = (vt + b3).astype(out_ref.dtype)

    return kernel


def mlp_noise_forward(obs, params, *, batch_tile=512, compute_dtype=jnp.float32):
    """Pallas forward for MLPNoise; applies torch.squeeze(v, -1) semantics."""
    w1, b1, w2, b2, w3, b3 = params
    B, obs_dim = obs.shape
    H1, H2, n_out = w1.shape[1], w2.shape[1], w3.shape[1]

    packed, offs = pack_params(params, dtype=compute_dtype)
    R, C = packed.shape

    # Batch tiling: single full-array tile for small batches; otherwise pad the
    # batch up to a multiple of `batch_tile` and run a 1-D "parallel" grid.
    if B <= batch_tile:
        TB, B_pad = B, B
        x = obs
    else:
        TB = batch_tile
        B_pad = pl.cdiv(B, TB) * TB
        x = jnp.pad(obs, ((0, B_pad - B), (0, 0))) if B_pad != B else obs
    x = x.astype(compute_dtype)
    nt = B_pad // TB

    kernel = _make_kernel(obs_dim, H1, H2, n_out, offs, compute_dtype)

    flops = 2 * B_pad * (obs_dim * H1 + H1 * H2 + H2 * n_out)
    bytes_accessed = (x.size * x.dtype.itemsize
                      + packed.size * packed.dtype.itemsize
                      + B_pad * n_out * 4)

    vt = pl.pallas_call(
        kernel,
        out_shape=jax.ShapeDtypeStruct((n_out, B_pad), jnp.float32),
        grid=(nt,),
        in_specs=[
            # x: one batch tile per grid step.
            pl.BlockSpec((TB, obs_dim), lambda i: (i, 0)),
            # packed params: constant block index -> VMEM-resident across steps.
            pl.BlockSpec((R, C), lambda i: (0, 0)),
        ],
        # Transposed output: (n_out, TB) block, lane-dense along the batch tile.
        out_specs=pl.BlockSpec((n_out, TB), lambda i: (0, i)),
        compiler_params=pltpu.CompilerParams(
            dimension_semantics=("parallel",)),
        cost_estimate=pl.CostEstimate(
            flops=flops, transcendentals=0, bytes_accessed=bytes_accessed),
    )(x, packed)

    # torch.squeeze(v, -1): remove the last axis only if it is size 1.
    if n_out == 1:
        return vt.reshape(B_pad)[:B]
    return vt.T[:B]


def init_params(key, obs_dim, hidden_sizes, n_outputs):
    """Deterministic init mimicking nn.Linear's U(-1/sqrt(fan_in), +1/sqrt(fan_in))."""
    sizes = [obs_dim] + list(hidden_sizes) + [n_outputs]
    params = []
    for i in range(len(sizes) - 1):
        fan_in, fan_out = sizes[i], sizes[i + 1]
        key, kw, kb = jax.random.split(key, 3)
        bound = 1.0 / (fan_in ** 0.5)
        w = jax.random.uniform(kw, (fan_in, fan_out), jnp.float32, -bound, bound)
        b = jax.random.uniform(kb, (1, fan_out), jnp.float32, -bound, bound)
        params.extend([w, b])
    return tuple(params)


def reference_forward(obs, params):
    """Plain-JAX reference for correctness checking."""
    w1, b1, w2, b2, w3, b3 = params
    h = jnp.maximum(obs @ w1 + b1, 0.0)
    h = jnp.maximum(h @ w2 + b2, 0.0)
    v = h @ w3 + b3
    return jnp.squeeze(v, axis=-1) if v.shape[-1] == 1 else v


if __name__ == "__main__":
    # Shapes consistent with the module: obs_dim=16, hidden_sizes=(32, 32),
    # activation=ReLU, n_outputs=1, small batch=8.
    obs_dim, hidden_sizes, n_outputs, batch = 16, (32, 32), 1, 8

    key = jax.random.PRNGKey(0)
    key, k_obs = jax.random.split(key)
    obs = jax.random.normal(k_obs, (batch, obs_dim), jnp.float32)
    params = init_params(key, obs_dim, hidden_sizes, n_outputs)

    # Small-batch (single tile) path.
    out = jax.block_until_ready(mlp_noise_forward(obs, params))
    ref = reference_forward(obs, params)
    assert out.shape == (batch,), f"expected shape ({batch},), got {out.shape}"
    assert jnp.allclose(out, ref, atol=1e-5, rtol=1e-5), "Pallas output mismatch vs reference"

    # Multi-tile path: batch > tile and not a multiple of it (exercises padding,
    # grid>1, resident weights, lane-dense output writeback).
    B2 = 1037
    key, k2 = jax.random.split(key)
    obs2 = jax.random.normal(k2, (B2, obs_dim), jnp.float32)
    out2 = jax.block_until_ready(mlp_noise_forward(obs2, params))
    ref2 = reference_forward(obs2, params)
    assert out2.shape == (B2,), f"expected shape ({B2},), got {out2.shape}"
    assert jnp.allclose(out2, ref2, atol=1e-5, rtol=1e-5), "Pallas (tiled) output mismatch vs reference"

    print("KERNEL_OK")
</pallas_src>

<mosaic_0001>
module attributes {stable_mosaic.version = 11 : i64} {
  func.func @kernel(%arg0: i32, %arg1: memref<8x16xf32, #tpu.memory_space<vmem>>, %arg2: memref<64x32xf32, #tpu.memory_space<vmem>>, %arg3: memref<1x8xf32, #tpu.memory_space<vmem>>) attributes {dimension_semantics = [#tpu.dimension_semantics<parallel>], iteration_bounds = array<i64: 1>, scalar_prefetch = 0 : i64, scratch_operands = 0 : i64, tpu.core_type = #tpu.core_type<tc>, window_params = [{transform_indices = @transform_0, window_bounds = array<i64: 8, 16>}, {pipeline_mode = #tpu.pipeline_mode<synchronous>, transform_indices = @transform_1, window_bounds = array<i64: 64, 32>}, {transform_indices = @transform_2, window_bounds = array<i64: 1, 8>}]} {
    %c0 = arith.constant 0 : index
    %c0_0 = arith.constant 0 : index
    %0 = vector.load %arg2[%c0, %c0_0] : memref<64x32xf32, #tpu.memory_space<vmem>>, vector<16x32xf32>
    %c16 = arith.constant 16 : index
    %c0_1 = arith.constant 0 : index
    %1 = vector.load %arg2[%c16, %c0_1] : memref<64x32xf32, #tpu.memory_space<vmem>>, vector<32x32xf32>
    %c48 = arith.constant 48 : index
    %c0_2 = arith.constant 0 : index
    %2 = vector.load %arg2[%c48, %c0_2] : memref<64x32xf32, #tpu.memory_space<vmem>>, vector<1x32xf32>
    %c56 = arith.constant 56 : index
    %c0_3 = arith.constant 0 : index
    %3 = vector.load %arg2[%c56, %c0_3] : memref<64x32xf32, #tpu.memory_space<vmem>>, vector<1x32xf32>
    %c57 = arith.constant 57 : index
    %c0_4 = arith.constant 0 : index
    %4 = vector.load %arg2[%c57, %c0_4] : memref<64x32xf32, #tpu.memory_space<vmem>>, vector<1x32xf32>
    %c58 = arith.constant 58 : index
    %c0_5 = arith.constant 0 : index
    %5 = vector.load %arg2[%c58, %c0_5] : memref<64x32xf32, #tpu.memory_space<vmem>>, vector<1x1xf32>
    %c0_6 = arith.constant 0 : index
    %c0_7 = arith.constant 0 : index
    %6 = vector.load %arg1[%c0_6, %c0_7] : memref<8x16xf32, #tpu.memory_space<vmem>>, vector<8x16xf32>
    %cst = arith.constant dense<0.000000e+00> : vector<8x32xf32>
    %7 = tpu.matmul %6, %0, %cst {dimension_numbers = #tpu.dot_dimension_numbers<[1], [0], [0], [1], [0, 0, 1, 1], [], []>} : vector<8x16xf32>, vector<16x32xf32>, vector<8x32xf32> -> vector<8x32xf32>
    %8 = vector.broadcast %3 : vector<1x32xf32> to vector<8x32xf32>
    %9 = arith.addf %7, %8 : vector<8x32xf32>
    %cst_8 = arith.constant 0.000000e+00 : f32
    %10 = vector.broadcast %cst_8 : f32 to vector<8x32xf32>
    %11 = arith.maximumf %9, %10 : vector<8x32xf32>
    %cst_9 = arith.constant dense<0.000000e+00> : vector<8x32xf32>
    %12 = tpu.matmul %11, %1, %cst_9 {dimension_numbers = #tpu.dot_dimension_numbers<[1], [0], [0], [1], [0, 0, 1, 1], [], []>} : vector<8x32xf32>, vector<32x32xf32>, vector<8x32xf32> -> vector<8x32xf32>
    %13 = vector.broadcast %4 : vector<1x32xf32> to vector<8x32xf32>
    %14 = arith.addf %12, %13 : vector<8x32xf32>
    %cst_10 = arith.constant 0.000000e+00 : f32
    %15 = vector.broadcast %cst_10 : f32 to vector<8x32xf32>
    %16 = arith.maximumf %14, %15 : vector<8x32xf32>
    %cst_11 = arith.constant dense<0.000000e+00> : vector<1x8xf32>
    %17 = tpu.matmul %2, %16, %cst_11 {dimension_numbers = #tpu.dot_dimension_numbers<[1], [1], [0], [0], [0, 0, 1, 0], [], []>} : vector<1x32xf32>, vector<8x32xf32>, vector<1x8xf32> -> vector<1x8xf32>
    %18 = vector.broadcast %5 : vector<1x1xf32> to vector<1x8xf32>
    %19 = arith.addf %17, %18 : vector<1x8xf32>
    %c0_12 = arith.constant 0 : index
    %c0_13 = arith.constant 0 : index
    %20 = vector.load %arg3[%c0_12, %c0_13] : memref<1x8xf32, #tpu.memory_space<vmem>>, vector<1x8xf32>
    tpu.vector_store %arg3[%c0_12, %c0_13], %19 {strides = array<i32>} : memref<1x8xf32, #tpu.memory_space<vmem>>, vector<1x8xf32>,
    return
  }
  func.func @transform_0(%arg0: i32) -> (i32, i32) {
    %c0_i32 = arith.constant 0 : i32
    %c0_i32_0 = arith.constant 0 : i32
    return %arg0, %c0_i32 : i32, i32
  }
  func.func @transform_1(%arg0: i32) -> (i32, i32) {
    %c0_i32 = arith.constant 0 : i32
    %c0_i32_0 = arith.constant 0 : i32
    %c0_i32_1 = arith.constant 0 : i32
    return %c0_i32, %c0_i32_0 : i32, i32
  }
  func.func @transform_2(%arg0: i32) -> (i32, i32) {
    %c0_i32 = arith.constant 0 : i32
    %c0_i32_0 = arith.constant 0 : i32
    return %c0_i32, %arg0 : i32, i32
  }
}

</mosaic_0001>

<bundles_post_ra>
// kernel: tpu_custom_call.1
= control target key start
LH: loop header
LB: loop body
LE: loop exit
PB: predicated region body
PF: predicated region fallthrough
CT: control target
= control target key end

     0   :  { %v356_v2 = vmov 0.0|0.0   ;;  %vm357_vm0 = vmmov 0   ;;  %v358_v4 = vmov 0.0   ;;  %s424_s0 = inlined_call_operand.vmem [shape: f32[8,16], index: 0, kind: input, shape index: {}]   ;;  %s425_s1 = inlined_call_operand.vmem [shape: f32[64,32], index: 1, kind: input, shape index: {}]   ;;  %s426_s2 = inlined_call_operand.hbm [shape: f32[1,8], index: 2, kind: output, shape index: {}]  }
   0x1   :  { %v12_v0 = vld [vmem:[%s425_s1] sm:$0xff]  ;;  %v13_v1 = vld [vmem:[%s425_s1 + $0x8] sm:$0xff]  ;;  %317 = vmatprep.subr.bf16.mxu0 %v356_v2  ;;  %298 = vmatprep.mubr.msk.f32.mxu0 %vm357_vm0, %v358_v4  ;;  %v14_v5 = vld [vmem:[%s425_s1 + $0x10] sm:$0xff] }
   0x2   :  { %v318_v3 = vpack.c.bf16 %v13_v1, %v12_v0  ;;  %v15_v6 = vld [vmem:[%s425_s1 + $0x18] sm:$0xff]  ;;  %320 = vmatprep.subr.bf16.mxu1 %v356_v2  ;;  %309 = vmatprep.mubr.msk.f32.mxu1 %vm357_vm0, %v358_v4 }
   0x3   :  { %v321_v7 = vpack.c.bf16 %v15_v6, %v14_v5 }
   0x4   :  { %7 = vsyncpa [#allocation3], 0  ;;  %319 = vmatpush3.bf16.msra.mxu0 %v318_v3  ;;  %v22_v8 = vld [vmem:[%s424_s0] sm:$0xff]  ;;  %vm27_vm1 = vcmask 130048   ;;  %v17_v10 = vld [vmem:[%s425_s1 + $0x28] sm:$0xff]  ;;  %vm106_vm2 = vcmask 261120  }
   0x5   :  { %322 = vmatpush3.bf16.msra.mxu1 %v321_v7  ;;  %312 = vmatprep.subr.mxu0 %v358_v4  ;;  %v16_v9 = vld [vmem:[%s425_s1 + $0x20] sm:$0xff]  ;;  %v278_v12 = vld [vmem:[%s425_s1 + $0x38] ss:$0 sm:$0xff]  ;;  %v21_v17 = vld [vmem:[%s425_s1 + $0x3a] sm:$0x1]  ;;  %v359_v18 = vmov 0  }
   0x6   :  { %323 = vmatprep.subr.bf16.mxu1 %v356_v2  ;;  %v324_v11 = vpack.c.bf16 %v17_v10, %v16_v9  ;;  %331 = vset.pattern.permute.xlu0 %v359_v18  ;;  %v280_v19 = vld [vmem:[%s425_s1 + $0x39] ss:$0 sm:$0xff]  ;;  %v18_v24 = vld [vmem:[%s425_s1 + $0x30] sm:$0x1]  ;;  %s360_s30 = smov [#allocation2]   ;;  %vm262_vm3 = vcmask 57344  }
   0x7   :  { %299 = vmatmul.mubr.msk.f32.vlgmr.msra.gmra.mrb[0].mxu0 %vm27_vm1, %v22_v8  ;;  %183 = vperm.xlu0 %331, %v21_v17   ;;  %s270_s3 = sshll.u32 %s360_s30, 4  ;;  %s271_s3 = int_to_ptr.vmem [resolvable:$true] %s270_s3 }
   0x8   :  { %314 = vmatprep.mubr.msk.f32.mxu0 %vm357_vm0, %v358_v4  ;;  %s332_s4 = scalar_lea.vmem %s271_s3, 16  ;;  %s336_s5 = scalar_lea.vmem %s271_s3, 32 }
   0x9   :  { %325 = vmatpush3.bf16.msra.mxu1 %v324_v11  ;;  %p333_p0 = scmp.ne.s32.totalorder %s271_s3, %s332_s4  ;;  %p337_p1 = scmp.lt.s32.totalorder %s271_s3, %s271_s3 }
   0xa   :  { %p338_p2 = scmp.lt.s32.totalorder %s336_s5, %s332_s4 }
   0xc   :  { %p339_p3 = por %p338_p2, %p337_p1 }
   0xe   :  { %p340_p4 = pnand %p339_p3, %p333_p0 }
  0x86   :  { %v184_v25 = vpop.permute.xlu0 %183 }
  0xda   :  { %v97_v13 = vpop.f32.mrb[0].mxu0 }
  0xdb   :  { %v98_v14 = vadd.f32 %v278_v12, %v97_v13  ;;  %v300_v15 = vpop.f32.mrb[1].mxu0 }
  0xdd   :  { %v101_v16 = vmax.f32 %v98_v14, 0.0 }
  0xdf   :  { %310 = vmatmul.mubr.msk.f32.vlgmr.msra.gmra.mrb[0].mxu1 %vm106_vm2, %v101_v16 }
 0x1b2   :  { %v176_v20 = vpop.f32.mrb[0].mxu1 }
 0x1b3   :  { %v177_v21 = vadd.f32 %v280_v19, %v176_v20  ;;  %v311_v22 = vpop.f32.mrb[1].mxu1 }
 0x1b5   :  { %v180_v23 = vmax.f32 %v177_v21, 0.0 }
 0x1b7   :  { %313 = vmatpush3.xpose.msk.msra.mxu0 %vm106_vm2, %v180_v23 }
 0x1ba   :  { %315 = vmatmul.mubr.msk.f32.vlgmr.msra.gmra.mrb[2].mxu0 %vm106_vm2, %v18_v24 }
 0x28d   :  { %v258_v26 = vpop.f32.mrb[2].mxu0 }
 0x28e   :  { %v259_v27 = vadd.f32 %v258_v26, %v184_v25  ;;  %v316_v28 = vpop.f32.mrb[3].mxu0 }
 0x290   :  { %263 = vst.msk [vmem:[#allocation2] sm:$0x1] %vm262_vm3, %v259_v27 }
 0x291   :  { %343 = shalt.err (!%p340_p4)
}
 0x292   :  { %s344_s7 = scalar_lea.hbm %s426_s2, 16 }
 0x293   :  { %p345_p5 = scmp.ne.s32.totalorder %s426_s2, %s344_s7  ;;  %p348_p6 = scmp.lt.u32.totalorder %s344_s7, %s426_s2 }
 0x295   :  { %p350_p7 = pnand %p348_p6, %p345_p5 }
 0x297   :  { %353 = shalt.err (!%p350_p7)
}
 0x298   :  { %273 = dma.vmem_to_hbm [thread:$0]  %s271_s3, 16, %s426_s2, [#allocation3]  }
 0x299   :  { %354 = dma.done.wait [#allocation3], 16  }
 0x29a   :  { %355 = vsyncadd [#allocation3], 4294967280 }
 0x29b   :  { %277 = vsyncpa [#allocation3], 1 }

</bundles_post_ra>
